<compile_context>
chip_gen: v7x
topology: tpu7x:2x2x1
jax: 0.10.0
libtpu: 0.0.40
codegen_flags: <defaults>
</compile_context>

<pallas_src>
import functools

import jax
import jax.numpy as jnp
from jax.experimental import pallas as pl
from jax.experimental.pallas import tpu as pltpu

NUM_CLASSES = 10
PADDED_CLASSES = 128   # lane-dense output slab (sliced back to 10 outside)
IN_FEATURES = 28 * 28  # 784
PADDED_IN = 896        # 7 * 128, zero-padded K dim for fc1


def mlp_logsoftmax_kernel(x_ref,
                          w1_ref, b1_ref,
                          w2_ref, b2_ref,
                          w3_ref, b3_ref,
                          w4_ref, b4_ref,
                          o_ref):
    # fc1 -> fc2 -> fc3 -> fc4 (no intermediate nonlinearity, matching the module),
    # then numerically stable log_softmax over the class dimension.
    # Weights are bf16 (in, out); activations cast to bf16 for the MXU, accumulate f32.
    x = x_ref[...].astype(jnp.bfloat16)
    h = jnp.dot(x, w1_ref[...], preferred_element_type=jnp.float32) + b1_ref[...]
    h = jnp.dot(h.astype(jnp.bfloat16), w2_ref[...],
                preferred_element_type=jnp.float32) + b2_ref[...]
    h = jnp.dot(h.astype(jnp.bfloat16), w3_ref[...],
                preferred_element_type=jnp.float32) + b3_ref[...]
    logits = jnp.dot(h.astype(jnp.bfloat16), w4_ref[...],
                     preferred_element_type=jnp.float32) + b4_ref[...]

    # log_softmax in f32.  Padded class columns carry bias -1e30 and zero weights,
    # so exp(pad - m) underflows to 0 and the result on the real 10 columns is exact.
    m = jnp.max(logits, axis=-1, keepdims=True)
    lse = m + jnp.log(jnp.sum(jnp.exp(logits - m), axis=-1, keepdims=True))
    o_ref[...] = (logits - lse).astype(o_ref.dtype)


def prepare_params(torch_style_params):
    """One-time conversion of PyTorch-layout params (W: (out,in), b: (out,))
    into the kernel layout: W (in,out) bf16 (padded), b (1,out) f32 (padded)."""
    (w1, b1), (w2, b2), (w3, b3), (w4, b4) = torch_style_params
    w1t = jnp.pad(w1.T, ((0, PADDED_IN - IN_FEATURES), (0, 0))).astype(jnp.bfloat16)
    w2t = w2.T.astype(jnp.bfloat16)
    w3t = w3.T.astype(jnp.bfloat16)
    w4t = jnp.pad(w4.T, ((0, 0), (0, PADDED_CLASSES - NUM_CLASSES))).astype(jnp.bfloat16)
    b1p = b1.reshape(1, -1).astype(jnp.float32)
    b2p = b2.reshape(1, -1).astype(jnp.float32)
    b3p = b3.reshape(1, -1).astype(jnp.float32)
    b4p = jnp.pad(b4.astype(jnp.float32),
                  (0, PADDED_CLASSES - NUM_CLASSES),
                  constant_values=-1e30).reshape(1, PADDED_CLASSES)
    return (w1t, b1p, w2t, b2p, w3t, b3p, w4t, b4p)


@functools.partial(jax.jit, static_argnames=("block_m",))
def net_forward(x, kparams, *, block_m=128):
    """x: (B, 1, 28, 28) or (B, 784) float32. Returns (B, 10) log-probs.

    block_m: batch tile (rows per grid step).  128 saturates the v5e MXU row dim;
    bump to 256-512 on v6e/v7x for large batches.
    """
    w1, b1, w2, b2, w3, b3, w4, b4 = kparams
    B = x.shape[0]
    x2d = x.reshape(B, IN_FEATURES).astype(jnp.float32)

    # Effective tile: a multiple of 8 sublanes, no larger than needed for small B.
    tile_m = min(block_m, max(8, ((B + 7) // 8) * 8))
    b_pad = ((B + tile_m - 1) // tile_m) * tile_m
    xp = jnp.pad(x2d, ((0, b_pad - B), (0, PADDED_IN - IN_FEATURES)))

    def const_spec(a):
        # Full-array block, constant index_map -> stays resident in VMEM across grid.
        return pl.BlockSpec(a.shape, lambda i: (0,) * a.ndim)

    out = pl.pallas_call(
        mlp_logsoftmax_kernel,
        out_shape=jax.ShapeDtypeStruct((b_pad, PADDED_CLASSES), jnp.float32),
        grid=(b_pad // tile_m,),
        in_specs=[
            pl.BlockSpec((tile_m, PADDED_IN), lambda i: (i, 0)),
            const_spec(w1), const_spec(b1),
            const_spec(w2), const_spec(b2),
            const_spec(w3), const_spec(b3),
            const_spec(w4), const_spec(b4),
        ],
        out_specs=pl.BlockSpec((tile_m, PADDED_CLASSES), lambda i: (i, 0)),
        compiler_params=pltpu.CompilerParams(
            dimension_semantics=("parallel",),
            vmem_limit_bytes=16 << 20,
        ),
    )(xp, w1, b1, w2, b2, w3, b3, w4, b4)

    return out[:B, :NUM_CLASSES]


def init_params(key):
    """Deterministic init mimicking nn.Linear shapes: W (out, in), b (out,)."""
    dims = [(28 * 28, 256), (256, 128), (128, 64), (64, 10)]
    params = []
    for i, (fan_in, fan_out) in enumerate(dims):
        kw, kb, key = jax.random.split(jax.random.fold_in(key, i), 3)
        bound = 1.0 / jnp.sqrt(fan_in)
        w = jax.random.uniform(kw, (fan_out, fan_in), jnp.float32, -bound, bound)
        b = jax.random.uniform(kb, (fan_out,), jnp.float32, -bound, bound)
        params.append((w, b))
    return params


if __name__ == "__main__":
    key = jax.random.PRNGKey(0)
    params = init_params(key)                 # PyTorch-style (out, in) layout
    kparams = prepare_params(params)          # one-time transpose/pad/bf16

    kx = jax.random.fold_in(key, 1234)
    x = jax.random.normal(kx, (8, 1, 28, 28), jnp.float32)  # small MNIST-like batch

    out = net_forward(x, kparams)
    jax.block_until_ready(out)

    # Sanity: log_softmax rows must (approximately) sum to 1 after exp.
    row_sums = jnp.exp(out).sum(axis=1)
    assert out.shape == (8, 10)
    assert jnp.allclose(row_sums, jnp.ones_like(row_sums), atol=1e-4)
    assert jnp.all(jnp.isfinite(out))

    print("KERNEL_OK")
</pallas_src>

<mosaic_0001>
module attributes {stable_mosaic.version = 11 : i64} {
  func.func @mlp_logsoftmax_kernel(%arg0: i32, %arg1: memref<8x896xf32, #tpu.memory_space<vmem>>, %arg2: memref<896x256xbf16, #tpu.memory_space<vmem>>, %arg3: memref<1x256xf32, #tpu.memory_space<vmem>>, %arg4: memref<256x128xbf16, #tpu.memory_space<vmem>>, %arg5: memref<1x128xf32, #tpu.memory_space<vmem>>, %arg6: memref<128x64xbf16, #tpu.memory_space<vmem>>, %arg7: memref<1x64xf32, #tpu.memory_space<vmem>>, %arg8: memref<64x128xbf16, #tpu.memory_space<vmem>>, %arg9: memref<1x128xf32, #tpu.memory_space<vmem>>, %arg10: memref<8x128xf32, #tpu.memory_space<vmem>>) attributes {dimension_semantics = [#tpu.dimension_semantics<parallel>], iteration_bounds = array<i64: 1>, scalar_prefetch = 0 : i64, scratch_operands = 0 : i64, tpu.core_type = #tpu.core_type<tc>, window_params = [{transform_indices = @transform_0, window_bounds = array<i64: 8, 896>}, {pipeline_mode = #tpu.pipeline_mode<synchronous>, transform_indices = @transform_1, window_bounds = array<i64: 896, 256>}, {pipeline_mode = #tpu.pipeline_mode<synchronous>, transform_indices = @transform_2, window_bounds = array<i64: 1, 256>}, {pipeline_mode = #tpu.pipeline_mode<synchronous>, transform_indices = @transform_3, window_bounds = array<i64: 256, 128>}, {pipeline_mode = #tpu.pipeline_mode<synchronous>, transform_indices = @transform_4, window_bounds = array<i64: 1, 128>}, {pipeline_mode = #tpu.pipeline_mode<synchronous>, transform_indices = @transform_5, window_bounds = array<i64: 128, 64>}, {pipeline_mode = #tpu.pipeline_mode<synchronous>, transform_indices = @transform_6, window_bounds = array<i64: 1, 64>}, {pipeline_mode = #tpu.pipeline_mode<synchronous>, transform_indices = @transform_7, window_bounds = array<i64: 64, 128>}, {pipeline_mode = #tpu.pipeline_mode<synchronous>, transform_indices = @transform_8, window_bounds = array<i64: 1, 128>}, {transform_indices = @transform_9, window_bounds = array<i64: 8, 128>}]} {
    %c0 = arith.constant 0 : index
    %c0_0 = arith.constant 0 : index
    %0 = vector.load %arg1[%c0, %c0_0] : memref<8x896xf32, #tpu.memory_space<vmem>>, vector<8x896xf32>
    %1 = arith.truncf %0 : vector<8x896xf32> to vector<8x896xbf16>
    %c0_1 = arith.constant 0 : index
    %c0_2 = arith.constant 0 : index
    %2 = vector.load %arg2[%c0_1, %c0_2] : memref<896x256xbf16, #tpu.memory_space<vmem>>, vector<896x256xbf16>
    %cst = arith.constant dense<0.000000e+00> : vector<8x256xf32>
    %3 = tpu.matmul %1, %2, %cst {dimension_numbers = #tpu.dot_dimension_numbers<[1], [0], [0], [1], [0, 0, 1, 1], [], []>} : vector<8x896xbf16>, vector<896x256xbf16>, vector<8x256xf32> -> vector<8x256xf32>
    %c0_3 = arith.constant 0 : index
    %c0_4 = arith.constant 0 : index
    %4 = vector.load %arg3[%c0_3, %c0_4] : memref<1x256xf32, #tpu.memory_space<vmem>>, vector<1x256xf32>
    %5 = vector.broadcast %4 : vector<1x256xf32> to vector<8x256xf32>
    %6 = arith.addf %3, %5 : vector<8x256xf32>
    %7 = arith.truncf %6 : vector<8x256xf32> to vector<8x256xbf16>
    %c0_5 = arith.constant 0 : index
    %c0_6 = arith.constant 0 : index
    %8 = vector.load %arg4[%c0_5, %c0_6] : memref<256x128xbf16, #tpu.memory_space<vmem>>, vector<256x128xbf16>
    %cst_7 = arith.constant dense<0.000000e+00> : vector<8x128xf32>
    %9 = tpu.matmul %7, %8, %cst_7 {dimension_numbers = #tpu.dot_dimension_numbers<[1], [0], [0], [1], [0, 0, 1, 1], [], []>} : vector<8x256xbf16>, vector<256x128xbf16>, vector<8x128xf32> -> vector<8x128xf32>
    %c0_8 = arith.constant 0 : index
    %c0_9 = arith.constant 0 : index
    %10 = vector.load %arg5[%c0_8, %c0_9] : memref<1x128xf32, #tpu.memory_space<vmem>>, vector<1x128xf32>
    %11 = vector.broadcast %10 : vector<1x128xf32> to vector<8x128xf32>
    %12 = arith.addf %9, %11 : vector<8x128xf32>
    %13 = arith.truncf %12 : vector<8x128xf32> to vector<8x128xbf16>
    %c0_10 = arith.constant 0 : index
    %c0_11 = arith.constant 0 : index
    %14 = vector.load %arg6[%c0_10, %c0_11] : memref<128x64xbf16, #tpu.memory_space<vmem>>, vector<128x64xbf16>
    %cst_12 = arith.constant dense<0.000000e+00> : vector<8x64xf32>
    %15 = tpu.matmul %13, %14, %cst_12 {dimension_numbers = #tpu.dot_dimension_numbers<[1], [0], [0], [1], [0, 0, 1, 1], [], []>} : vector<8x128xbf16>, vector<128x64xbf16>, vector<8x64xf32> -> vector<8x64xf32>
    %c0_13 = arith.constant 0 : index
    %c0_14 = arith.constant 0 : index
    %16 = vector.load %arg7[%c0_13, %c0_14] : memref<1x64xf32, #tpu.memory_space<vmem>>, vector<1x64xf32>
    %17 = vector.broadcast %16 : vector<1x64xf32> to vector<8x64xf32>
    %18 = arith.addf %15, %17 : vector<8x64xf32>
    %19 = arith.truncf %18 : vector<8x64xf32> to vector<8x64xbf16>
    %c0_15 = arith.constant 0 : index
    %c0_16 = arith.constant 0 : index
    %20 = vector.load %arg8[%c0_15, %c0_16] : memref<64x128xbf16, #tpu.memory_space<vmem>>, vector<64x128xbf16>
    %cst_17 = arith.constant dense<0.000000e+00> : vector<8x128xf32>
    %21 = tpu.matmul %19, %20, %cst_17 {dimension_numbers = #tpu.dot_dimension_numbers<[1], [0], [0], [1], [0, 0, 1, 1], [], []>} : vector<8x64xbf16>, vector<64x128xbf16>, vector<8x128xf32> -> vector<8x128xf32>
    %c0_18 = arith.constant 0 : index
    %c0_19 = arith.constant 0 : index
    %22 = vector.load %arg9[%c0_18, %c0_19] : memref<1x128xf32, #tpu.memory_space<vmem>>, vector<1x128xf32>
    %23 = vector.broadcast %22 : vector<1x128xf32> to vector<8x128xf32>
    %24 = arith.addf %21, %23 : vector<8x128xf32>
    %cst_20 = arith.constant dense<0xFF800000> : vector<8xf32>
    %25 = vector.multi_reduction <maximumf>, %24, %cst_20 [1] : vector<8x128xf32> to vector<8xf32>
    %26 = vector.shape_cast %25 : vector<8xf32> to vector<8x1xf32>
    %27 = vector.broadcast %26 : vector<8x1xf32> to vector<8x128xf32>
    %28 = arith.subf %24, %27 : vector<8x128xf32>
    %29 = math.exp %28 : vector<8x128xf32>
    %cst_21 = arith.constant dense<0.000000e+00> : vector<8xf32>
    %30 = vector.multi_reduction <add>, %29, %cst_21 [1] : vector<8x128xf32> to vector<8xf32>
    %31 = vector.shape_cast %30 : vector<8xf32> to vector<8x1xf32>
    %32 = math.log %31 : vector<8x1xf32>
    %33 = arith.addf %26, %32 : vector<8x1xf32>
    %34 = vector.broadcast %33 : vector<8x1xf32> to vector<8x128xf32>
    %35 = arith.subf %24, %34 : vector<8x128xf32>
    %c0_22 = arith.constant 0 : index
    %c0_23 = arith.constant 0 : index
    %36 = vector.load %arg10[%c0_22, %c0_23] : memref<8x128xf32, #tpu.memory_space<vmem>>, vector<8x128xf32>
    tpu.vector_store %arg10[%c0_22, %c0_23], %35 {strides = array<i32>} : memref<8x128xf32, #tpu.memory_space<vmem>>, vector<8x128xf32>,
    return
  }
  func.func @transform_0(%arg0: i32) -> (i32, i32) {
    %c0_i32 = arith.constant 0 : i32
    %c0_i32_0 = arith.constant 0 : i32
    return %arg0, %c0_i32 : i32, i32
  }
  func.func @transform_1(%arg0: i32) -> (i32, i32) {
    %c0_i32 = arith.constant 0 : i32
    %c0_i32_0 = arith.constant 0 : i32
    %c0_i32_1 = arith.constant 0 : i32
    return %c0_i32, %c0_i32_0 : i32, i32
  }
  func.func @transform_2(%arg0: i32) -> (i32, i32) {
    %c0_i32 = arith.constant 0 : i32
    %c0_i32_0 = arith.constant 0 : i32
    %c0_i32_1 = arith.constant 0 : i32
    return %c0_i32, %c0_i32_0 : i32, i32
  }
  func.func @transform_3(%arg0: i32) -> (i32, i32) {
    %c0_i32 = arith.constant 0 : i32
    %c0_i32_0 = arith.constant 0 : i32
    %c0_i32_1 = arith.constant 0 : i32
    return %c0_i32, %c0_i32_0 : i32, i32
  }
  func.func @transform_4(%arg0: i32) -> (i32, i32) {
    %c0_i32 = arith.constant 0 : i32
    %c0_i32_0 = arith.constant 0 : i32
    %c0_i32_1 = arith.constant 0 : i32
    return %c0_i32, %c0_i32_0 : i32, i32
  }
  func.func @transform_5(%arg0: i32) -> (i32, i32) {
    %c0_i32 = arith.constant 0 : i32
    %c0_i32_0 = arith.constant 0 : i32
    %c0_i32_1 = arith.constant 0 : i32
    return %c0_i32, %c0_i32_0 : i32, i32
  }
  func.func @transform_6(%arg0: i32) -> (i32, i32) {
    %c0_i32 = arith.constant 0 : i32
    %c0_i32_0 = arith.constant 0 : i32
    %c0_i32_1 = arith.constant 0 : i32
    return %c0_i32, %c0_i32_0 : i32, i32
  }
  func.func @transform_7(%arg0: i32) -> (i32, i32) {
    %c0_i32 = arith.constant 0 : i32
    %c0_i32_0 = arith.constant 0 : i32
    %c0_i32_1 = arith.constant 0 : i32
    return %c0_i32, %c0_i32_0 : i32, i32
  }
  func.func @transform_8(%arg0: i32) -> (i32, i32) {
    %c0_i32 = arith.constant 0 : i32
    %c0_i32_0 = arith.constant 0 : i32
    %c0_i32_1 = arith.constant 0 : i32
    return %c0_i32, %c0_i32_0 : i32, i32
  }
  func.func @transform_9(%arg0: i32) -> (i32, i32) {
    %c0_i32 = arith.constant 0 : i32
    %c0_i32_0 = arith.constant 0 : i32
    return %arg0, %c0_i32 : i32, i32
  }
}

</mosaic_0001>

<bundles_post_ra>
// kernel: net_forward.1
= control target key start
LH: loop header
LB: loop body
LE: loop exit
PB: predicated region body
PF: predicated region fallthrough
CT: control target
= control target key end

     0   :  { %14 = vsyncpa [#allocation3], 0  ;;  %s2516_s0 = inlined_call_operand.vmem [shape: f32[8,896], index: 0, kind: input, shape index: {}]   ;;  %s2517_s1 = inlined_call_operand.vmem [shape: bf16[896,256], index: 1, kind: input, shape index: {}]   ;;  %s2518_s2 = inlined_call_operand.hbm [shape: f32[1,256], index: 2, kind: input, shape index: {}]   ;;  %s2519_s3 = inlined_call_operand.vmem [shape: bf16[256,128], index: 3, kind: input, shape index: {}]   ;;  %s2520_s4 = inlined_call_operand.hbm [shape: f32[1,128], index: 4, kind: input, shape index: {}]   ;;  %s2521_s5 = inlined_call_operand.vmem [shape: bf16[128,64], index: 5, kind: input, shape index: {}]   ;;  %s2522_s6 = inlined_call_operand.hbm [shape: f32[1,64], index: 6, kind: input, shape index: {}]   ;;  %s2523_s7 = inlined_call_operand.hbm [shape: bf16[64,128], index: 7, kind: input, shape index: {}]   ;;  %s2524_s8 = inlined_call_operand.hbm [shape: f32[1,128], index: 8, kind: input, shape index: {}]   ;;  %s2525_s9 = inlined_call_operand.hbm [shape: f32[8,128], index: 9, kind: output, shape index: {}]  }
   0x1   :  { %15 = vsyncpa [#allocation6], 0 }
   0x2   :  { %16 = vsyncpa [#allocation9], 0 }
   0x3   :  { %17 = vsyncpa [#allocation4], 0  ;;  %s1933_s30 = smov [#allocation5]   ;;  %s1934_s11 = smov [#allocation8]  }
   0x4   :  { %s40_s10 = sshll.u32 %s1933_s30, 4  ;;  %s61_s12 = sshll.u32 %s1934_s11, 4  ;;  %s41_s10 = int_to_ptr.vmem [resolvable:$true] %s40_s10  ;;  %s1994_s12 = int_to_ptr.vmem [resolvable:$true] %s61_s12 }
   0x5   :  { %s1793_s15 = scalar_lea.hbm %s2520_s4, 16 }
   0x6   :  { %p1794_p0 = scmp.ne.s32.totalorder %s2520_s4, %s1793_s15  ;;  %p1797_p1 = scmp.lt.u32.totalorder %s1793_s15, %s2520_s4 }
   0x8   :  { %p1799_p2 = pnand %p1797_p1, %p1794_p0 }
   0xa   :  { %1802 = shalt.err (!%p1799_p2)
}
   0xb   :  { %s1803_s20 = scalar_lea.vmem %s41_s10, 16  ;;  %s1807_s21 = scalar_lea.vmem %s41_s10, 32 }
   0xc   :  { %p1804_p3 = scmp.ne.s32.totalorder %s41_s10, %s1803_s20  ;;  %p1808_p4 = scmp.lt.s32.totalorder %s41_s10, %s41_s10 }
   0xd   :  { %p1809_p5 = scmp.lt.s32.totalorder %s1807_s21, %s1803_s20 }
   0xf   :  { %p1810_p6 = por %p1809_p5, %p1808_p4 }
  0x11   :  { %p1811_p7 = pnand %p1810_p6, %p1804_p3 }
  0x13   :  { %1814 = shalt.err (!%p1811_p7)
}
  0x14   :  { %43 = dma.hbm_to_vmem [thread:$0]  %s2520_s4, 16, %s41_s10, [#allocation6]  }
  0x15   :  { %s1815_s26 = scalar_lea.hbm %s2523_s7, 512 }
  0x16   :  { %p1816_p8 = scmp.ne.s32.totalorder %s2523_s7, %s1815_s26  ;;  %p1819_p9 = scmp.lt.u32.totalorder %s1815_s26, %s2523_s7 }
  0x18   :  { %p1821_p10 = pnand %p1819_p9, %p1816_p8 }
  0x1a   :  { %1824 = shalt.err (!%p1821_p10)
}
  0x1b   :  { %s1825_s11 = scalar_lea.vmem %s1994_s12, 512  ;;  %p1830_p12 = scmp.lt.s32.totalorder %s1994_s12, %s1994_s12 }
  0x1c   :  { %p1826_p11 = scmp.ne.s32.totalorder %s1994_s12, %s1825_s11  ;;  %p1831_p13 = scmp.lt.s32.totalorder %s1825_s11, %s1825_s11 }
  0x1e   :  { %p1832_p0 = por %p1831_p13, %p1830_p12 }
  0x20   :  { %p1833_p1 = pnand %p1832_p0, %p1826_p11 }
  0x22   :  { %1836 = shalt.err (!%p1833_p1)
}
  0x23   :  { %s1935_s4 = smov 64   ;;  %s1936_s10 = smov 4  }
  0x24   :  { %67 = dma.hbm_to_vmem [thread:$0]  %s2523_s7, 512, %s1994_s12, [#allocation9], %s1935_s4, %s1935_s4, %s1936_s10  }
  0x25   :  { %s1937_s15 = smov [#allocation2]   ;;  %s1938_s17 = smov [#allocation7]  }
  0x26   :  { %s28_s16 = sshll.u32 %s1937_s15, 4  ;;  %s52_s18 = sshll.u32 %s1938_s17, 4  ;;  %s29_s16 = int_to_ptr.vmem [resolvable:$true] %s28_s16  ;;  %s53_s18 = int_to_ptr.vmem [resolvable:$true] %s52_s18 }
  0x27   :  { %s1837_s21 = scalar_lea.hbm %s2518_s2, 32 }
  0x28   :  { %p1838_p2 = scmp.ne.s32.totalorder %s2518_s2, %s1837_s21  ;;  %p1841_p3 = scmp.lt.u32.totalorder %s1837_s21, %s2518_s2 }
  0x2a   :  { %p1843_p4 = pnand %p1841_p3, %p1838_p2 }
  0x2c   :  { %1846 = shalt.err (!%p1843_p4)
}
  0x2d   :  { %s1847_s7 = scalar_lea.vmem %s29_s16, 32  ;;  %p1852_p6 = scmp.lt.s32.totalorder %s29_s16, %s29_s16 }
  0x2e   :  { %p1848_p5 = scmp.ne.s32.totalorder %s29_s16, %s1847_s7  ;;  %p1853_p7 = scmp.lt.s32.totalorder %s1847_s7, %s1847_s7 }
  0x30   :  { %p1854_p8 = por %p1853_p7, %p1852_p6 }
  0x32   :  { %p1855_p9 = pnand %p1854_p8, %p1848_p5 }
  0x34   :  { %1858 = shalt.err (!%p1855_p9)
}
  0x35   :  { %31 = dma.hbm_to_vmem [thread:$0]  %s2518_s2, 32, %s29_s16, [#allocation3]  }
  0x36   :  { %s1859_s29 = scalar_lea.hbm %s2522_s6, 16 }
  0x37   :  { %p1860_p10 = scmp.ne.s32.totalorder %s2522_s6, %s1859_s29  ;;  %p1863_p11 = scmp.lt.u32.totalorder %s1859_s29, %s2522_s6 }
  0x39   :  { %p1865_p12 = pnand %p1863_p11, %p1860_p10 }
  0x3b   :  { %1868 = shalt.err (!%p1865_p12)
}
  0x3c   :  { %s1869_s13 = scalar_lea.vmem %s53_s18, 16  ;;  %s1873_s14 = scalar_lea.vmem %s53_s18, 32 }
  0x3d   :  { %p1870_p13 = scmp.ne.s32.totalorder %s53_s18, %s1869_s13  ;;  %p1874_p0 = scmp.lt.s32.totalorder %s53_s18, %s53_s18 }
  0x3e   :  { %p1875_p1 = scmp.lt.s32.totalorder %s1873_s14, %s1869_s13 }
  0x40   :  { %p1876_p2 = por %p1875_p1, %p1874_p0 }
  0x42   :  { %p1877_p3 = pnand %p1876_p2, %p1870_p13 }
  0x44   :  { %1880 = shalt.err (!%p1877_p3)
}
  0x45   :  { %55 = dma.hbm_to_vmem [thread:$0]  %s2522_s6, 16, %s53_s18, [#allocation6]  }
  0x46   :  { %s1939_s16 = smov [#allocation10]   ;;  %s1881_s21 = scalar_lea.hbm %s2524_s8, 16 }
  0x47   :  { %s74_s17 = sshll.u32 %s1939_s16, 4  ;;  %p1882_p4 = scmp.ne.s32.totalorder %s2524_s8, %s1881_s21  ;;  %s75_s17 = int_to_ptr.vmem [resolvable:$true] %s74_s17 }
  0x48   :  { %p1885_p5 = scmp.lt.u32.totalorder %s1881_s21, %s2524_s8 }
  0x4a   :  { %p1887_p6 = pnand %p1885_p5, %p1882_p4 }
  0x4c   :  { %1890 = shalt.err (!%p1887_p6)
}
  0x4d   :  { %s1891_s7 = scalar_lea.vmem %s75_s17, 16  ;;  %s1895_s6 = scalar_lea.vmem %s75_s17, 32 }
  0x4e   :  { %p1892_p7 = scmp.ne.s32.totalorder %s75_s17, %s1891_s7  ;;  %p1896_p8 = scmp.lt.s32.totalorder %s75_s17, %s75_s17 }
  0x4f   :  { %p1897_p9 = scmp.lt.s32.totalorder %s1895_s6, %s1891_s7 }
  0x51   :  { %p1898_p10 = por %p1897_p9, %p1896_p8 }
  0x53   :  { %p1899_p11 = pnand %p1898_p10, %p1892_p7 }
  0x55   :  { %1902 = shalt.err (!%p1899_p11)
}
  0x56   :  { %77 = dma.hbm_to_vmem [thread:$0]  %s2524_s8, 16, %s75_s17, [#allocation9]  }
  0x57   :  { %1925 = dma.done.wait [#allocation3], 32  }
  0x58   :  { %1926 = vsyncadd [#allocation3], 4294967264 }
  0x59   :  { %1927 = dma.done.wait [#allocation6], 32  }
  0x5a   :  { %1928 = vsyncadd [#allocation6], 4294967264 }
  0x5b   :  { %1929 = dma.done.wait [#allocation9], 528  }
  0x5c   :  { %1930 = vsyncadd [#allocation9], 4294966768  ;;  %v1593_v0 = vld [vmem:[%s2517_s1 + $0x104] ss:$8 sps:$4 sm:$0xff]   ;;  %v1595_v1 = vld [vmem:[%s2517_s1 + $0x100] ss:$8 sps:$4 sm:$0xff]  }
  0x5d   :  { %833 = vmatprep.subr.bf16.mxu0 %v1593_v0  ;;  %v1596_v2 = vld [vmem:[%s2517_s1 + $0x114] ss:$8 sps:$4 sm:$0xff]   ;;  %v1598_v3 = vld [vmem:[%s2517_s1 + $0x110] ss:$8 sps:$4 sm:$0xff]   ;;  %v1599_v4 = vld [vmem:[%s2517_s1 + $0x124] ss:$8 sps:$4 sm:$0xff]  }
  0x5e   :  { %834 = vmatpush1.bf16.msra.mxu0 %v1595_v1  ;;  %v1601_v5 = vld [vmem:[%s2517_s1 + $0x120] ss:$8 sps:$4 sm:$0xff]   ;;  %v1602_v6 = vld [vmem:[%s2517_s1 + $0x134] ss:$8 sps:$4 sm:$0xff]   ;;  %v1604_v7 = vld [vmem:[%s2517_s1 + $0x130] ss:$8 sps:$4 sm:$0xff]  }
  0x5f   :  { %835 = vmatprep.subr.bf16.mxu0 %v1596_v2  ;;  %v1605_v8 = vld [vmem:[%s2517_s1 + $0x144] ss:$8 sps:$4 sm:$0xff]   ;;  %v1607_v9 = vld [vmem:[%s2517_s1 + $0x140] ss:$8 sps:$4 sm:$0xff]   ;;  %v1608_v10 = vld [vmem:[%s2517_s1 + $0x154] ss:$8 sps:$4 sm:$0xff]  }
  0x60   :  { %v1610_v11 = vld [vmem:[%s2517_s1 + $0x150] ss:$8 sps:$4 sm:$0xff]   ;;  %v1611_v12 = vld [vmem:[%s2517_s1 + $0x164] ss:$8 sps:$4 sm:$0xff]   ;;  %v1613_v15 = vld [vmem:[%s2517_s1 + $0x160] ss:$8 sps:$4 sm:$0xff]  }
  0x61   :  { %v97_v13 = vld [vmem:[%s2516_s0 + $0x18] sm:$0xff]  ;;  %v1617_v18 = vld [vmem:[%s2517_s1 + $0x184] ss:$8 sps:$4 sm:$0xff]   ;;  %v1619_v19 = vld [vmem:[%s2517_s1 + $0x180] ss:$8 sps:$4 sm:$0xff]   ;;  %vm1942_vm0 = vmmov 0  }
  0x62   :  { %836 = vmatpush1.bf16.msra.mxu0 %v1598_v3  ;;  %v104_v14 = vpack.c.bf16 %v97_v13, %v97_v13  ;;  %v1614_v16 = vld [vmem:[%s2517_s1 + $0x174] ss:$8 sps:$4 sm:$0xff]   ;;  %v1616_v17 = vld [vmem:[%s2517_s1 + $0x170] ss:$8 sps:$4 sm:$0xff]   ;;  %v1662_v21 = vld [vmem:[%s2517_s1 + $0x4] ss:$8 sps:$4 sm:$0xff]  }
  0x63   :  { %837 = vmatprep.subr.bf16.mxu0 %v1599_v4  ;;  %v1620_v20 = vld [vmem:[%s2517_s1 + $0x194] ss:$8 sps:$4 sm:$0xff]   ;;  %v1664_v22 = vld [vmem:[%s2517_s1] ss:$8 sps:$4 sm:$0xff]   ;;  %v1622_v23 = vld [vmem:[%s2517_s1 + $0x190] ss:$8 sps:$4 sm:$0xff]   ;;  %792 = vmatprep.subr.bf16.mxu1 %v1662_v21 }
  0x64   :  { %865 = vmatprep.mubr.bf16.mxu0 %v104_v14  ;;  %v1668_v24 = vld [vmem:[%s2517_s1 + $0x14] ss:$8 sps:$4 sm:$0xff]   ;;  %793 = vmatpush1.bf16.msra.mxu1 %v1664_v22  ;;  %v1670_v25 = vld [vmem:[%s2517_s1 + $0x10] ss:$8 sps:$4 sm:$0xff]   ;;  %v1623_v26 = vld [vmem:[%s2517_s1 + $0x1a4] ss:$8 sps:$4 sm:$0xff]  }
  0x65   :  { %794 = vmatprep.subr.bf16.mxu1 %v1668_v24  ;;  %v1674_v27 = vld [vmem:[%s2517_s1 + $0x24] ss:$8 sps:$4 sm:$0xff]   ;;  %v1625_v28 = vld [vmem:[%s2517_s1 + $0x1a0] ss:$8 sps:$4 sm:$0xff]   ;;  %v1626_v30 = vld [vmem:[%s2517_s1 + $0x1b4] ss:$8 sps:$4 sm:$0xff]  }
  0x66   :  { %838 = vmatpush1.bf16.msra.mxu0 %v1601_v5  ;;  %v1676_v29 = vld [vmem:[%s2517_s1 + $0x20] ss:$8 sps:$4 sm:$0xff]   ;;  %v1680_v31 = vld [vmem:[%s2517_s1 + $0x34] ss:$8 sps:$4 sm:$0xff]   ;;  %v1628_v32 = vld [vmem:[%s2517_s1 + $0x1b0] ss:$8 sps:$4 sm:$0xff]  }
  0x67   :  { %839 = vmatprep.subr.bf16.mxu0 %v1602_v6  ;;  %v1682_v33 = vld [vmem:[%s2517_s1 + $0x30] ss:$8 sps:$4 sm:$0xff]   ;;  %v1629_v34 = vld [vmem:[%s2517_s1 + $0x1c4] ss:$8 sps:$4 sm:$0xff]   ;;  %v1631_v36 = vld [vmem:[%s2517_s1 + $0x1c0] ss:$8 sps:$4 sm:$0xff]  }
  0x68   :  { %795 = vmatpush1.bf16.msra.mxu1 %v1670_v25  ;;  %v1686_v35 = vld [vmem:[%s2517_s1 + $0x44] ss:$8 sps:$4 sm:$0xff]   ;;  %v1688_v37 = vld [vmem:[%s2517_s1 + $0x40] ss:$8 sps:$4 sm:$0xff]   ;;  %v1632_v38 = vld [vmem:[%s2517_s1 + $0x1d4] ss:$8 sps:$4 sm:$0xff]  }
  0x69   :  { %796 = vmatprep.subr.bf16.mxu1 %v1674_v27  ;;  %v1692_v39 = vld [vmem:[%s2517_s1 + $0x54] ss:$8 sps:$4 sm:$0xff]   ;;  %v1634_v40 = vld [vmem:[%s2517_s1 + $0x1d0] ss:$8 sps:$4 sm:$0xff]   ;;  %v1635_v42 = vld [vmem:[%s2517_s1 + $0x1e4] ss:$8 sps:$4 sm:$0xff]  }
  0x6a   :  { %840 = vmatpush1.bf16.msra.mxu0 %v1604_v7  ;;  %v1694_v41 = vld [vmem:[%s2517_s1 + $0x50] ss:$8 sps:$4 sm:$0xff]   ;;  %v1698_v43 = vld [vmem:[%s2517_s1 + $0x64] ss:$8 sps:$4 sm:$0xff]   ;;  %v1637_v44 = vld [vmem:[%s2517_s1 + $0x1e0] ss:$8 sps:$4 sm:$0xff]  }
  0x6b   :  { %841 = vmatprep.subr.bf16.mxu0 %v1605_v8  ;;  %v1700_v45 = vld [vmem:[%s2517_s1 + $0x60] ss:$8 sps:$4 sm:$0xff]   ;;  %v1638_v46 = vld [vmem:[%s2517_s1 + $0x1f4] ss:$8 sps:$4 sm:$0xff]   ;;  %v1640_v48 = vld [vmem:[%s2517_s1 + $0x1f0] ss:$8 sps:$4 sm:$0xff]  }
  0x6c   :  { %797 = vmatpush1.bf16.msra.mxu1 %v1676_v29  ;;  %v1704_v47 = vld [vmem:[%s2517_s1 + $0x74] ss:$8 sps:$4 sm:$0xff]   ;;  %v1643_v49 = vld [vmem:[%s2517_s1 + $0x204] ss:$8 sps:$4 sm:$0xff]   ;;  %v1706_v51 = vld [vmem:[%s2517_s1 + $0x70] ss:$8 sps:$4 sm:$0xff]  }
  0x6d   :  { %798 = vmatprep.subr.bf16.mxu1 %v1680_v31  ;;  %v96_v50 = vld [vmem:[%s2516_s0 + $0x10] sm:$0xff]  ;;  %v1710_v52 = vld [vmem:[%s2517_s1 + $0x84] ss:$8 sps:$4 sm:$0xff]   ;;  %v1641_v53 = vld [vmem:[%s2517_s1 + $0x200] ss:$8 sps:$4 sm:$0xff]   ;;  %vm1285_vm1 = vcmask 523264  }
  0x6e   :  { %842 = vmatpush1.bf16.msra.mxu0 %v1607_v9  ;;  %v103_v54 = vpack.c.bf16 %v96_v50, %v96_v50  ;;  %v99_v55 = vld [vmem:[%s2516_s0 + $0x28] sm:$0xff]  ;;  %v1646_v56 = vld [vmem:[%s2517_s1 + $0x214] ss:$8 sps:$4 sm:$0xff]   ;;  %v1644_v60 = vld [vmem:[%s2517_s1 + $0x210] ss:$8 sps:$4 sm:$0xff]  }
  0x6f   :  { %843 = vmatprep.subr.bf16.mxu0 %v1608_v10  ;;  %v1712_v57 = vld [vmem:[%s2517_s1 + $0x80] ss:$8 sps:$4 sm:$0xff]   ;;  %v1716_v58 = vld [vmem:[%s2517_s1 + $0x94] ss:$8 sps:$4 sm:$0xff]   ;;  %v106_v59 = vpack.c.bf16 %v99_v55, %v99_v55  ;;  %v1649_v61 = vld [vmem:[%s2517_s1 + $0x224] ss:$8 sps:$4 sm:$0xff]  }
  0x70   :  { %799 = vmatpush1.bf16.msra.mxu1 %v1682_v33  ;;  %v1718_v62 = vld [vmem:[%s2517_s1 + $0x90] ss:$8 sps:$4 sm:$0xff]   ;;  %v1722_v63 = vld [vmem:[%s2517_s1 + $0xa4] ss:$8 sps:$4 sm:$0xff]   ;;  %v1647_v0 = vld [vmem:[%s2517_s1 + $0x220] ss:$8 sps:$4 sm:$0xff]  }
  0x71   :  { %800 = vmatprep.subr.bf16.mxu1 %v1686_v35  ;;  %v1652_v1 = vld [vmem:[%s2517_s1 + $0x234] ss:$8 sps:$4 sm:$0xff]   ;;  %v1724_v2 = vld [vmem:[%s2517_s1 + $0xa0] ss:$8 sps:$4 sm:$0xff]   ;;  %v1650_v4 = vld [vmem:[%s2517_s1 + $0x230] ss:$8 sps:$4 sm:$0xff]  }
  0x72   :  { %844 = vmatpush1.bf16.msra.mxu0 %v1610_v11  ;;  %v1728_v3 = vld [vmem:[%s2517_s1 + $0xb4] ss:$8 sps:$4 sm:$0xff]   ;;  %v95_v5 = vld [vmem:[%s2516_s0 + $0x8] sm:$0xff]  ;;  %v1730_v6 = vld [vmem:[%s2517_s1 + $0xb0] ss:$8 sps:$4 sm:$0xff]  }
  0x73   :  { %845 = vmatprep.subr.bf16.mxu0 %v1611_v12  ;;  %v102_v7 = vpack.c.bf16 %v95_v5, %v95_v5  ;;  %v1655_v8 = vld [vmem:[%s2517_s1 + $0x244] ss:$8 sps:$4 sm:$0xff]   ;;  %v1653_v10 = vld [vmem:[%s2517_s1 + $0x240] ss:$8 sps:$4 sm:$0xff]   ;;  %v1658_v11 = vld [vmem:[%s2517_s1 + $0x254] ss:$8 sps:$4 sm:$0xff]  }
  0x74   :  { %801 = vmatpush1.bf16.msra.mxu1 %v1688_v37  ;;  %v1734_v9 = vld [vmem:[%s2517_s1 + $0xc4] ss:$8 sps:$4 sm:$0xff]   ;;  %v1736_v12 = vld [vmem:[%s2517_s1 + $0xc0] ss:$8 sps:$4 sm:$0xff]   ;;  %v1740_v13 = vld [vmem:[%s2517_s1 + $0xd4] ss:$8 sps:$4 sm:$0xff]  }
  0x75   :  { %802 = vmatprep.subr.bf16.mxu1 %v1692_v39  ;;  %824 = vmatprep.mubr.bf16.mxu1 %v102_v7  ;;  %v1656_v14 = vld [vmem:[%s2517_s1 + $0x250] ss:$8 sps:$4 sm:$0xff]   ;;  %v1752_v21 = vld [vmem:[%s2517_s1 + $0xf4] ss:$8 sps:$4 sm:$0xff]   ;;  %v94_v24 = vld [vmem:[%s2516_s0] sm:$0xff] }
  0x76   :  { %846 = vmatpush1.bf16.msra.mxu0 %v1613_v15  ;;  %v1661_v15 = vld [vmem:[%s2517_s1 + $0x264] ss:$8 sps:$4 sm:$0xff]   ;;  %v1665_v22 = vld [vmem:[%s2517_s1 + $0x270] ss:$8 sps:$4 sm:$0xff]   ;;  %v1671_v27 = vld [vmem:[%s2517_s1 + $0x280] ss:$8 sps:$4 sm:$0xff]  }
  0x77   :  { %847 = vmatprep.subr.bf16.mxu0 %v1614_v16  ;;  %v1742_v16 = vld [vmem:[%s2517_s1 + $0xd0] ss:$8 sps:$4 sm:$0xff]   ;;  %v1673_v25 = vld [vmem:[%s2517_s1 + $0x284] ss:$8 sps:$4 sm:$0xff]   ;;  %v1679_v29 = vld [vmem:[%s2517_s1 + $0x294] ss:$8 sps:$4 sm:$0xff]  }
  0x78   :  { %803 = vmatpush1.bf16.msra.mxu1 %v1694_v41  ;;  %v1763_v31 = vld [vmem:[%s2519_s3 + $0x48] sm:$0xff]   ;;  %v1765_v35 = vld [vmem:[%s2519_s3 + $0x50] sm:$0xff]   ;;  %v1767_v39 = vld [vmem:[%s2519_s3 + $0x58] sm:$0xff]  }
  0x79   :  { %804 = vmatprep.subr.bf16.mxu1 %v1698_v43  ;;  %v1764_v33 = vld [vmem:[%s2519_s3 + $0x8] sm:$0xff]   ;;  %v1766_v37 = vld [vmem:[%s2519_s3 + $0x10] sm:$0xff]   ;;  %v1768_v41 = vld [vmem:[%s2519_s3 + $0x18] sm:$0xff]  }
  0x7a   :  { %848 = vmatpush1.bf16.msra.mxu0 %v1616_v17  ;;  %v1746_v17 = vld [vmem:[%s2517_s1 + $0xe4] ss:$8 sps:$4 sm:$0xff]   ;;  %v1715_v50 = vld [vmem:[%s2517_s1 + $0x2f4] ss:$8 sps:$4 sm:$0xff]   ;;  %v1719_v55 = vld [vmem:[%s2517_s1 + $0x300] ss:$8 sps:$4 sm:$0xff]  }
  0x7b   :  { %849 = vmatprep.subr.bf16.mxu0 %v1617_v18  ;;  %v1659_v18 = vld [vmem:[%s2517_s1 + $0x260] ss:$8 sps:$4 sm:$0xff]   ;;  %v1760_v5 = vld [vmem:[%s2517_s1 + $0x374] ss:$8 sps:$4 sm:$0xff]  }
  0x7c   :  { %805 = vmatpush1.bf16.msra.mxu1 %v1700_v45  ;;  %v1769_v43 = vld [vmem:[%s2519_s3 + $0x60] sm:$0xff]   ;;  %v100_v7 = vld [vmem:[%s2516_s0 + $0x30] sm:$0xff] }
  0x7d   :  { %806 = vmatprep.subr.bf16.mxu1 %v1704_v47  ;;  %v1770_v45 = vld [vmem:[%s2519_s3 + $0x20] sm:$0xff]   ;;  %v1701_v47 = vld [vmem:[%s2517_s1 + $0x2d0] ss:$8 sps:$4 sm:$0xff]  }
  0x7e   :  { %850 = vmatpush1.bf16.msra.mxu0 %v1619_v19  ;;  %v1667_v19 = vld [vmem:[%s2517_s1 + $0x274] ss:$8 sps:$4 sm:$0xff]  }
  0x7f   :  { %851 = vmatprep.subr.bf16.mxu0 %v1620_v20  ;;  %v1748_v20 = vld [vmem:[%s2517_s1 + $0xe0] ss:$8 sps:$4 sm:$0xff]  }
  0x80   :  { %807 = vmatpush1.bf16.msra.mxu1 %v1706_v51  ;;  %v1713_v51 = vld [vmem:[%s2517_s1 + $0x2f0] ss:$8 sps:$4 sm:$0xff]  }
  0x81   :  { %808 = vmatprep.subr.bf16.mxu1 %v1710_v52  ;;  %v98_v52 = vld [vmem:[%s2516_s0 + $0x20] sm:$0xff] }
  0x82   :  { %852 = vmatpush1.bf16.msra.mxu0 %v1622_v23  ;;  %v1754_v23 = vld [vmem:[%s2517_s1 + $0xf0] ss:$8 sps:$4 sm:$0xff]  }
  0x83   :  { %853 = vmatprep.subr.bf16.mxu0 %v1623_v26  ;;  %v1761_v26 = vld [vmem:[%s2519_s3 + $0x40] sm:$0xff]  }
  0x84   :  { %809 = vmatpush1.bf16.msra.mxu1 %v1712_v57  ;;  %v1725_v57 = vld [vmem:[%s2517_s1 + $0x310] ss:$8 sps:$4 sm:$0xff]  }
  0x85   :  { %810 = vmatprep.subr.bf16.mxu1 %v1716_v58  ;;  %v1940_v58 = vmov 0  }
  0x86   :  { %854 = vmatpush1.bf16.msra.mxu0 %v1625_v28  ;;  %v1762_v28 = vld [vmem:[%s2519_s3] sm:$0xff]  }
  0x87   :  { %855 = vmatprep.subr.bf16.mxu0 %v1626_v30  ;;  %v101_v30 = vpack.c.bf16 %v94_v24, %v94_v24 }
  0x88   :  { %811 = vmatpush1.bf16.msra.mxu1 %v1718_v62  ;;  %v1737_v62 = vld [vmem:[%s2517_s1 + $0x330] ss:$8 sps:$4 sm:$0xff]  }
  0x89   :  { %812 = vmatprep.subr.bf16.mxu1 %v1722_v63  ;;  %v1745_v63 = vld [vmem:[%s2517_s1 + $0x344] ss:$8 sps:$4 sm:$0xff]  }
  0x8a   :  { %856 = vmatpush1.bf16.msra.mxu0 %v1628_v32  ;;  %v1677_v32 = vld [vmem:[%s2517_s1 + $0x290] ss:$8 sps:$4 sm:$0xff]  }
  0x8b   :  { %857 = vmatprep.subr.bf16.mxu0 %v1629_v34  ;;  %v1685_v34 = vld [vmem:[%s2517_s1 + $0x2a4] ss:$8 sps:$4 sm:$0xff]  }
  0x8c   :  { %813 = vmatpush1.bf16.msra.mxu1 %v1724_v2  ;;  %v1749_v2 = vld [vmem:[%s2517_s1 + $0x350] ss:$8 sps:$4 sm:$0xff]  }
  0x8d   :  { %814 = vmatprep.subr.bf16.mxu1 %v1728_v3  ;;  %v1757_v3 = vld [vmem:[%s2517_s1 + $0x364] ss:$8 sps:$4 sm:$0xff]  }
  0x8e   :  { %858 = vmatpush1.bf16.msra.mxu0 %v1631_v36  ;;  %v1683_v36 = vld [vmem:[%s2517_s1 + $0x2a0] ss:$8 sps:$4 sm:$0xff]  }
  0x8f   :  { %859 = vmatprep.subr.bf16.mxu0 %v1632_v38  ;;  %v1691_v38 = vld [vmem:[%s2517_s1 + $0x2b4] ss:$8 sps:$4 sm:$0xff]  }
  0x90   :  { %815 = vmatpush1.bf16.msra.mxu1 %v1730_v6  ;;  %v1758_v6 = vld [vmem:[%s2517_s1 + $0x370] ss:$8 sps:$4 sm:$0xff]  }
  0x91   :  { %816 = vmatprep.subr.bf16.mxu1 %v1734_v9  ;;  %v1771_v9 = vld [vmem:[%s2519_s3 + $0x68] sm:$0xff]  }
  0x92   :  { %860 = vmatpush1.bf16.msra.mxu0 %v1634_v40  ;;  %v1689_v40 = vld [vmem:[%s2517_s1 + $0x2b0] ss:$8 sps:$4 sm:$0xff]  }
  0x93   :  { %861 = vmatprep.subr.bf16.mxu0 %v1635_v42  ;;  %v1697_v42 = vld [vmem:[%s2517_s1 + $0x2c4] ss:$8 sps:$4 sm:$0xff]  }
  0x94   :  { %817 = vmatpush1.bf16.msra.mxu1 %v1736_v12  ;;  %v1774_v12 = vld [vmem:[%s2519_s3 + $0x30] sm:$0xff]  }
  0x95   :  { %818 = vmatprep.subr.bf16.mxu1 %v1740_v13  ;;  %v1775_v13 = vld [vmem:[%s2519_s3 + $0x78] sm:$0xff]  }
  0x96   :  { %862 = vmatpush1.bf16.msra.mxu0 %v1637_v44  ;;  %v1695_v44 = vld [vmem:[%s2517_s1 + $0x2c0] ss:$8 sps:$4 sm:$0xff]  }
  0x97   :  { %863 = vmatprep.subr.bf16.mxu0 %v1638_v46  ;;  %v1703_v46 = vld [vmem:[%s2517_s1 + $0x2d4] ss:$8 sps:$4 sm:$0xff]  }
  0x98   :  { %819 = vmatpush1.bf16.msra.mxu1 %v1742_v16 }
  0x99   :  { %820 = vmatprep.subr.bf16.mxu1 %v1746_v17 }
  0x9a   :  { %864 = vmatpush1.bf16.msra.mxu0 %v1640_v48  ;;  %v1709_v48 = vld [vmem:[%s2517_s1 + $0x2e4] ss:$8 sps:$4 sm:$0xff]  }
  0x9b   :  { %874 = vmatprep.subr.bf16.mxu0 %v1643_v49  ;;  %v1707_v49 = vld [vmem:[%s2517_s1 + $0x2e0] ss:$8 sps:$4 sm:$0xff]  }
  0x9c   :  { %821 = vmatpush1.bf16.msra.mxu1 %v1748_v20  ;;  %v222_v20 = vlaneseq }
  0x9d   :  { %866 = vmatmul.mubr.bf16.vlgmr.msra.gmra.mrb[0].mxu0 %v103_v54  ;;  %822 = vmatprep.subr.bf16.mxu1 %v1752_v21  ;;  %v105_v54 = vpack.c.bf16 %v98_v52, %v98_v52  ;;  %v1785_v52 = vld [vmem:[#allocation8] sm:$0xff]  }
  0x9e   :  { %875 = vmatpush1.bf16.msra.mxu0 %v1641_v53  ;;  %906 = vmatprep.mubr.bf16.mxu0 %v106_v59  ;;  %v1721_v53 = vld [vmem:[%s2517_s1 + $0x304] ss:$8 sps:$4 sm:$0xff]   ;;  %v223_v21 = vshrl.u32 %v222_v20, 7 }
  0x9f   :  { %876 = vmatprep.subr.bf16.mxu0 %v1646_v56  ;;  %v1727_v56 = vld [vmem:[%s2517_s1 + $0x314] ss:$8 sps:$4 sm:$0xff]   ;;  %v1733_v59 = vld [vmem:[%s2517_s1 + $0x324] ss:$8 sps:$4 sm:$0xff]  }
  0xa0   :  { %823 = vmatpush1.bf16.msra.mxu1 %v1754_v23  ;;  %v220_v23 = vld [vmem:[#allocation2] sm:$0x3]  ;;  %v228_v24 = vsub.s32 1, %v223_v21 }
  0xa1   :  { %1502 = vmatprep.subr.bf16.mxu1 %v1761_v26 }
  0xa2   :  { %877 = vmatpush1.bf16.msra.mxu0 %v1644_v60  ;;  %v1731_v60 = vld [vmem:[%s2517_s1 + $0x320] ss:$8 sps:$4 sm:$0xff]   ;;  %v229_v26 = vrot.slane %v220_v23, %v228_v24 }
  0xa3   :  { %878 = vmatprep.subr.bf16.mxu0 %v1649_v61  ;;  %825 = vmatmul.mubr.bf16.vlgmr.msra.gmra.mrb[0].mxu1 %v101_v30  ;;  %v1739_v61 = vld [vmem:[%s2517_s1 + $0x334] ss:$8 sps:$4 sm:$0xff]  }
  0xa4   :  { %1503 = vmatpush3.bf16.msra.mxu1 %v1762_v28 }
  0xa5   :  { %1504 = vmatprep.subr.bf16.mxu1 %v1763_v31 }
  0xa6   :  { %879 = vmatpush1.bf16.msra.mxu0 %v1647_v0  ;;  %v1743_v0 = vld [vmem:[%s2517_s1 + $0x340] ss:$8 sps:$4 sm:$0xff]  }
  0xa7   :  { %880 = vmatprep.subr.bf16.mxu0 %v1652_v1  ;;  %v1751_v1 = vld [vmem:[%s2517_s1 + $0x354] ss:$8 sps:$4 sm:$0xff]  }
  0xa8   :  { %1505 = vmatpush3.bf16.msra.mxu1 %v1764_v33 }
  0xa9   :  { %1506 = vmatprep.subr.bf16.mxu1 %v1765_v35 }
  0xaa   :  { %881 = vmatpush1.bf16.msra.mxu0 %v1650_v4  ;;  %v1755_v4 = vld [vmem:[%s2517_s1 + $0x360] ss:$8 sps:$4 sm:$0xff]  }
  0xab   :  { %882 = vmatprep.subr.bf16.mxu0 %v1655_v8  ;;  %v107_v8 = vpack.c.bf16 %v100_v7, %v100_v7 }
  0xac   :  { %1507 = vmatpush3.bf16.msra.mxu1 %v1766_v37 }
  0xad   :  { %1508 = vmatprep.subr.bf16.mxu1 %v1767_v39  ;;  %v1779_v39 = vld [vmem:[%s2521_s5 + $0x10] sm:$0xff]  }
  0xae   :  { %883 = vmatpush1.bf16.msra.mxu0 %v1653_v10  ;;  %v1772_v10 = vld [vmem:[%s2519_s3 + $0x28] sm:$0xff]  }
  0xaf   :  { %884 = vmatprep.subr.bf16.mxu0 %v1658_v11  ;;  %v1773_v11 = vld [vmem:[%s2519_s3 + $0x70] sm:$0xff]  }
  0xb0   :  { %1509 = vmatpush3.bf16.msra.mxu1 %v1768_v41  ;;  %v1781_v41 = vld [vmem:[%s2521_s5 + $0x20] sm:$0xff]  }
  0xb1   :  { %1510 = vmatprep.subr.bf16.mxu1 %v1769_v43  ;;  %v1783_v43 = vld [vmem:[%s2521_s5 + $0x30] sm:$0xff]  }
  0xb2   :  { %885 = vmatpush1.bf16.msra.mxu0 %v1656_v14  ;;  %v1776_v14 = vld [vmem:[%s2519_s3 + $0x38] sm:$0xff]  }
  0xb3   :  { %886 = vmatprep.subr.bf16.mxu0 %v1661_v15  ;;  %v1941_v15 = vmov 0.0  }
  0xb4   :  { %1511 = vmatpush3.bf16.msra.mxu1 %v1770_v45 }
  0xb5   :  { %1512 = vmatprep.subr.bf16.mxu1 %v1771_v9 }
  0xb6   :  { %887 = vmatpush1.bf16.msra.mxu0 %v1659_v18 }
  0xb7   :  { %888 = vmatprep.subr.bf16.mxu0 %v1667_v19 }
  0xb8   :  { %1513 = vmatpush3.bf16.msra.mxu1 %v1772_v10 }
  0xb9   :  { %1514 = vmatprep.subr.bf16.mxu1 %v1773_v11 }
  0xba   :  { %889 = vmatpush1.bf16.msra.mxu0 %v1665_v22  ;;  %v224_v22 = vsub.s32 0, %v223_v21 }
  0xbb   :  { %890 = vmatprep.subr.bf16.mxu0 %v1673_v25 }
  0xbc   :  { %1515 = vmatpush3.bf16.msra.mxu1 %v1774_v12  ;;  %v225_v25 = vrot.slane %v220_v23, %v224_v22 }
  0xbd   :  { %1516 = vmatprep.subr.bf16.mxu1 %v1775_v13 }
  0xbe   :  { %891 = vmatpush1.bf16.msra.mxu0 %v1671_v27 }
  0xbf   :  { %892 = vmatprep.subr.bf16.mxu0 %v1679_v29 }
  0xc0   :  { %1517 = vmatpush3.bf16.msra.mxu1 %v1776_v14 }
  0xc1   :  { %1538 = vmatprep.subr.bf16.mxu1 %v1941_v15 }
  0xc2   :  { %893 = vmatpush1.bf16.msra.mxu0 %v1677_v32 }
  0xc3   :  { %894 = vmatprep.subr.bf16.mxu0 %v1685_v34 }
  0xc6   :  { %895 = vmatpush1.bf16.msra.mxu0 %v1683_v36  ;;  %v1777_v36 = vld [vmem:[%s2521_s5] sm:$0xff]  }
  0xc7   :  { %896 = vmatprep.subr.bf16.mxu0 %v1691_v38  ;;  %v1778_v38 = vld [vmem:[%s2521_s5 + $0x8] sm:$0xff]  }
  0xca   :  { %897 = vmatpush1.bf16.msra.mxu0 %v1689_v40  ;;  %v1780_v40 = vld [vmem:[%s2521_s5 + $0x18] sm:$0xff]  }
  0xcb   :  { %898 = vmatprep.subr.bf16.mxu0 %v1697_v42  ;;  %v1782_v42 = vld [vmem:[%s2521_s5 + $0x28] sm:$0xff]  }
  0xce   :  { %899 = vmatpush1.bf16.msra.mxu0 %v1695_v44  ;;  %v1784_v44 = vld [vmem:[%s2521_s5 + $0x38] sm:$0xff]   ;;  %s1943_s5 = smov [#allocation11]  }
  0xcf   :  { %900 = vmatprep.subr.bf16.mxu0 %v1703_v46  ;;  %v1470_v46 = vld [vmem:[#allocation5] ss:$0 sm:$0xff]  ;;  %s1347_s6 = sshll.u32 %s1943_s5, 4  ;;  %s1348_s6 = int_to_ptr.vmem [resolvable:$true] %s1347_s6 }
  0xd0   :  { %s1903_s18 = scalar_lea.vmem %s1348_s6, 128  ;;  %p1908_p13 = scmp.lt.s32.totalorder %s1348_s6, %s1348_s6 }
  0xd1   :  { %p1904_p12 = scmp.ne.s32.totalorder %s1348_s6, %s1903_s18  ;;  %p1909_p0 = scmp.lt.s32.totalorder %s1903_s18, %s1903_s18 }
  0xd2   :  { %901 = vmatpush1.bf16.msra.mxu0 %v1701_v47 }
  0xd3   :  { %902 = vmatprep.subr.bf16.mxu0 %v1709_v48  ;;  %p1910_p1 = por %p1909_p0, %p1908_p13 }
  0xd5   :  { %p1911_p2 = pnand %p1910_p1, %p1904_p12 }
  0xd6   :  { %903 = vmatpush1.bf16.msra.mxu0 %v1707_v49 }
  0xd7   :  { %904 = vmatprep.subr.bf16.mxu0 %v1715_v50 }
  0xda   :  { %905 = vmatpush1.bf16.msra.mxu0 %v1713_v51 }
  0xdb   :  { %915 = vmatprep.subr.bf16.mxu0 %v1721_v53 }
  0xdd   :  { %907 = vmatmul.mubr.bf16.vlgmr.msra.gmra.mrb[0].mxu0 %v105_v54  ;;  %v1786_v54 = vld [vmem:[#allocation8 + $0x8] sm:$0xff]  }
  0xde   :  { %916 = vmatpush1.bf16.msra.mxu0 %v1719_v55  ;;  %947 = vmatprep.mubr.bf16.mxu0 %v1940_v58  ;;  %v1787_v55 = vld [vmem:[#allocation8 + $0x10] sm:$0xff]  }
  0xdf   :  { %917 = vmatprep.subr.bf16.mxu0 %v1727_v56  ;;  %v1788_v56 = vld [vmem:[#allocation8 + $0x18] sm:$0xff]  }
  0xe2   :  { %918 = vmatpush1.bf16.msra.mxu0 %v1725_v57  ;;  %v1487_v57 = vld [vmem:[#allocation7] ss:$0 sm:$0xff] }
  0xe3   :  { %919 = vmatprep.subr.bf16.mxu0 %v1733_v59 }
  0xe6   :  { %920 = vmatpush1.bf16.msra.mxu0 %v1731_v60 }
  0xe7   :  { %921 = vmatprep.subr.bf16.mxu0 %v1739_v61 }
  0xea   :  { %922 = vmatpush1.bf16.msra.mxu0 %v1737_v62 }
  0xeb   :  { %923 = vmatprep.subr.bf16.mxu0 %v1745_v63 }
  0xee   :  { %924 = vmatpush1.bf16.msra.mxu0 %v1743_v0  ;;  %v1496_v0 = vld [vmem:[#allocation10] ss:$0 sm:$0xff] }
  0xef   :  { %925 = vmatprep.subr.bf16.mxu0 %v1751_v1 }
  0xf2   :  { %926 = vmatpush1.bf16.msra.mxu0 %v1749_v2 }
  0xf3   :  { %927 = vmatprep.subr.bf16.mxu0 %v1757_v3 }
  0xf6   :  { %928 = vmatpush1.bf16.msra.mxu0 %v1755_v4 }
  0xf7   :  { %929 = vmatprep.subr.bf16.mxu0 %v1760_v5 }
  0xfa   :  { %930 = vmatpush1.bf16.msra.mxu0 %v1758_v6 }
  0xfd   :  { %948 = vmatmul.mubr.bf16.vlgmr.msra.gmra.mrb[0].mxu0 %v107_v8 }
 0x176   :  { %v826_v16 = vpop.f32.mrb[0].mxu1 }
 0x177   :  { %v828_v17 = vpop.f32.mrb[1].mxu1  ;;  %v827_v27 = vadd.f32 %v826_v16, %v225_v25 }
 0x178   :  { %v830_v18 = vpop.f32.mrb[2].mxu1  ;;  %v829_v28 = vadd.f32 %v828_v17, %v229_v26 }
 0x179   :  { %v831_v19 = vpop.f32.mrb[3].mxu1 }
 0x1d0   :  { %v949_v29 = vpop.f32.mrb[0].mxu0 }
 0x1d1   :  { %v1571_v30 = vadd.f32 %v949_v29, %v827_v27  ;;  %v951_v31 = vpop.f32.mrb[1].mxu0 }
 0x1d2   :  { %v1573_v32 = vadd.f32 %v951_v31, %v829_v28  ;;  %v953_v33 = vpop.f32.mrb[2].mxu0 }
 0x1d3   :  { %v954_v34 = vpop.f32.mrb[3].mxu0  ;;  %v956_v37 = vpack.c.bf16 %v1571_v30, %v1571_v30 }
 0x1d4   :  { %v957_v35 = vpack.c.bf16 %v1573_v32, %v1573_v32 }
 0x1d6   :  { %1125 = vmatprep.mubr.bf16.mxu1 %v957_v35 }
 0x1d7   :  { %1126 = vmatmul.mubr.bf16.vlgmr.msra.gmra.mrb[4].mxu1 %v956_v37 }
 0x1d8   :  { %1539 = vmatpush3.bf16.msra.mxu1 %v1777_v36  ;;  %1554 = vmatprep.mubr.msk.bf16.mxu1 %vm1942_vm0, %v1941_v15 }
 0x1d9   :  { %1540 = vmatprep.subr.bf16.mxu1 %v1941_v15 }
 0x1dc   :  { %1541 = vmatpush3.bf16.msra.mxu1 %v1778_v38 }
 0x1dd   :  { %1542 = vmatprep.subr.bf16.mxu1 %v1941_v15 }
 0x1e0   :  { %1543 = vmatpush3.bf16.msra.mxu1 %v1779_v39 }
 0x1e1   :  { %1544 = vmatprep.subr.bf16.mxu1 %v1941_v15 }
 0x1e4   :  { %1545 = vmatpush3.bf16.msra.mxu1 %v1780_v40 }
 0x1e5   :  { %1546 = vmatprep.subr.bf16.mxu1 %v1941_v15 }
 0x1e8   :  { %1547 = vmatpush3.bf16.msra.mxu1 %v1781_v41 }
 0x1e9   :  { %1548 = vmatprep.subr.bf16.mxu1 %v1941_v15 }
 0x1ec   :  { %1549 = vmatpush3.bf16.msra.mxu1 %v1782_v42 }
 0x1ed   :  { %1550 = vmatprep.subr.bf16.mxu1 %v1941_v15 }
 0x1f0   :  { %1551 = vmatpush3.bf16.msra.mxu1 %v1783_v43 }
 0x1f1   :  { %1552 = vmatprep.subr.bf16.mxu1 %v1941_v15 }
 0x1f4   :  { %1553 = vmatpush3.bf16.msra.mxu1 %v1784_v44 }
 0x1f5   :  { %1558 = vmatprep.subr.bf16.mxu1 %v1941_v15 }
 0x2aa   :  { %v1518_v45 = vpop.f32.mrb[4].mxu1 }
 0x2ab   :  { %v1519_v47 = vpop.f32.mrb[5].mxu1 }
 0x2ac   :  { %v1520_v48 = vadd.f32 %v1519_v47, %v1518_v45  ;;  %v1521_v49 = vpop.f32.mrb[6].mxu1 }
 0x2ad   :  { %v1522_v50 = vpop.f32.mrb[7].mxu1 }
 0x2ae   :  { %v1128_v51 = vadd.f32 %v1520_v48, %v1470_v46 }
 0x2b0   :  { %v1133_v53 = vpack.c.bf16 %v1128_v51, %v1128_v51 }
 0x2b2   :  { %1555 = vmatmul.mubr.bf16.vlgmr.msra.gmra.mrb[8].mxu1 %v1133_v53 }
 0x2b3   :  { %1559 = vmatpush3.bf16.msra.mxu1 %v1785_v52  ;;  %1566 = vmatprep.mubr.msk.bf16.mxu1 %vm1942_vm0, %v1941_v15 }
 0x2b4   :  { %1560 = vmatprep.subr.bf16.mxu1 %v1941_v15 }
 0x2b7   :  { %1561 = vmatpush3.bf16.msra.mxu1 %v1786_v54 }
 0x2b8   :  { %1562 = vmatprep.subr.bf16.mxu1 %v1941_v15 }
 0x2bb   :  { %1563 = vmatpush3.bf16.msra.mxu1 %v1787_v55 }
 0x2bc   :  { %1564 = vmatprep.subr.bf16.mxu1 %v1941_v15 }
 0x2bf   :  { %1565 = vmatpush3.bf16.msra.mxu1 %v1788_v56 }
 0x385   :  { %v1239_v58 = vpop.f32.mrb[8].mxu1 }
 0x386   :  { %v1240_v59 = vadd.f32 %v1487_v57, %v1239_v58  ;;  %v1556_v60 = vpop.f32.mrb[9].mxu1 }
 0x387   :  { %v1242_v61 = vpop.f32.mrb[10].mxu1 }
 0x388   :  { %v1245_v62 = vpack.c.bf16 %v1240_v59, %v1240_v59  ;;  %v1557_v63 = vpop.f32.mrb[11].mxu1 }
 0x38a   :  { %1567 = vmatmul.mubr.msk.bf16.vlgmr.msra.gmra.mrb[12].mxu1 %vm1285_vm1, %v1245_v62 }
 0x45d   :  { %v1323_v1 = vpop.f32.mrb[12].mxu1 }
 0x45e   :  { %v1324_v2 = vadd.f32 %v1496_v0, %v1323_v1  ;;  %v1568_v3 = vpop.f32.mrb[13].mxu1 }
 0x45f   :  { %v1326_v4 = vpop.f32.mrb[14].mxu1 }
 0x460   :  { %1329 = vmax.xlane.f32.xlu0 %v1324_v2  ;;  %v1569_v5 = vpop.f32.mrb[15].mxu1 }
 0x4ed   :  { %v1330_v6 = vpop.xlane.xlu0 %1329 }
 0x4ee   :  { %v1331_v7 = vsub.f32 %v1324_v2, %v1330_v6 }
 0x4f0   :  { %v1332_v8 = vmul.f32 1.442695, %v1331_v7 }
 0x4f2   :  { %1789 = vpow2.f32 %v1332_v8 }
 0x4fc   :  { %v1790_v9 = vpop.eup %1789 }
 0x4fd   :  { %1334 = vadd.xlane.f32.xlu0 %v1790_v9 }
 0x58a   :  { %v1335_v10 = vpop.xlane.xlu0 %1334 }
 0x58b   :  { %1791 = vlog2.f32 %v1335_v10 }
 0x595   :  { %v1792_v11 = vpop.eup %1791 }
 0x596   :  { %v1337_v12 = vmul.f32 0.6931472, %v1792_v11 }
 0x598   :  { %v1338_v13 = vadd.f32 %v1337_v12, %v1330_v6 }
 0x59a   :  { %v1339_v14 = vsub.f32 %v1324_v2, %v1338_v13 }
 0x59c   :  { %1340 = vst [vmem:[#allocation11] sm:$0xff] %v1339_v14 }
 0x59d   :  { %1914 = shalt.err (!%p1911_p2)
}
 0x59e   :  { %s1915_s27 = scalar_lea.hbm %s2525_s9, 128 }
 0x59f   :  { %p1916_p3 = scmp.ne.s32.totalorder %s2525_s9, %s1915_s27  ;;  %p1919_p4 = scmp.lt.u32.totalorder %s1915_s27, %s2525_s9 }
 0x5a1   :  { %p1921_p5 = pnand %p1919_p4, %p1916_p3 }
 0x5a3   :  { %1924 = shalt.err (!%p1921_p5)
}
 0x5a4   :  { %1350 = dma.vmem_to_hbm [thread:$0]  %s1348_s6, 128, %s2525_s9, [#allocation4]  }
 0x5a5   :  { %1931 = dma.done.wait [#allocation4], 128  }
 0x5a6   :  { %1932 = vsyncadd [#allocation4], 4294967168 }
 0x5a7   :  { %1354 = vsyncpa [#allocation3], 1 }
 0x5a8   :  { %1355 = vsyncpa [#allocation6], 1 }
 0x5a9   :  { %1356 = vsyncpa [#allocation9], 1 }
 0x5aa   :  { %1357 = vsyncpa [#allocation4], 1 }

</bundles_post_ra>
